<compile_context>
chip_gen: v7x
topology: tpu7x:2x2x1
jax: 0.10.0
libtpu: 0.0.40
codegen_flags: <defaults>
</compile_context>

<pallas_src>
import functools
import math

import jax
import jax.numpy as jnp
import numpy as np
from jax.experimental import pallas as pl
from jax.experimental.pallas import tpu as pltpu

# ---------------- config (small, consistent with the module) ----------------
B = 2        # batch
S = 8        # seq len
D = 32       # feature dim (RMSNorm dim)
EPS = 1e-5

_LANES = 128                              # vreg lane width
_VMEM_BLOCK_BUDGET = 24 * 1024 * 1024     # double-buffered in+out block budget (v7x-safe)
_VMEM_LIMIT_BYTES = 48 * 1024 * 1024      # explicit scoped-VMEM limit for Mosaic
_MIN_SPLIT_BYTES = 4 * 1024 * 1024        # above this, force >= 2 grid steps (v7x 2 TCs)


# ---------------- the RMSNorm kernel ----------------
def rmsnorm_kernel(x_ref, w_ref, seg_ref, segt_ref, o_ref, *, inv_d, eps):
    """One row-block of lane-packed RMSNorm.

    x_ref   : (block_rows, width)  -- `pack` logical rows per physical 128-lane row
    w_ref   : (1, width)           -- weight tiled `pack` times, pre-cast in wrapper
    seg_ref : (width, pack)        -- block-diagonal ones (segment-sum matrix)
    segt_ref: (pack, width)        -- its transpose (segment-broadcast matrix)
    o_ref   : (block_rows, width)
    """
    xf = x_ref[...].astype(jnp.float32)                        # x.float()
    # Per-logical-row sum of squares on the (otherwise idle) MXU.
    ss = jnp.dot(xf * xf, seg_ref[...],
                 precision=jax.lax.Precision.HIGHEST,
                 preferred_element_type=jnp.float32)            # (block_rows, pack)
    scale = jax.lax.rsqrt(ss * inv_d + eps)                     # EUP rsqrt
    # Broadcast each segment's scale back over its D lanes (second tiny matmul).
    scale_b = jnp.dot(scale, segt_ref[...],
                      precision=jax.lax.Precision.HIGHEST,
                      preferred_element_type=jnp.float32)       # (block_rows, width)
    xn = (xf * scale_b).astype(x_ref.dtype)                     # .type_as(x)
    o_ref[...] = (xn * w_ref[...]).astype(o_ref.dtype)          # * weight


def _pick_block_rows(total_rows, row_bytes):
    """Largest row block that (a) keeps double-buffered in+out blocks under the VMEM
    budget, (b) leaves >= 2 grid steps for large inputs (v7x megacore), and (c) is a
    multiple-of-8 divisor of total_rows when the grid has more than one step."""
    max_rows = max(8, _VMEM_BLOCK_BUDGET // (2 * row_bytes))        # x2: double buffering
    if total_rows * row_bytes >= _MIN_SPLIT_BYTES:
        max_rows = min(max_rows, max(8, (total_rows // 2) // 8 * 8))
    if total_rows <= max_rows:
        return total_rows                   # single step: block == full array shape
    cand = (max_rows // 8) * 8
    while cand >= 8:
        if total_rows % cand == 0:
            return cand
        cand -= 8
    # TODO(synk): masked tail block for row counts with no multiple-of-8 divisor.
    return total_rows


def rmsnorm(x, weight, *, eps=EPS, block_rows=None):
    """Pallas RMSNorm over the last axis of x. weight has shape (D,)."""
    orig_shape = x.shape
    d = x.shape[-1]
    rows = int(np.prod(x.shape[:-1]))
    # torch: `norm.type_as(x) * weight` promotes like x.dtype * weight.dtype.
    out_dtype = jnp.result_type(x.dtype, weight.dtype)

    # ---- lane-dense packing: `pack` logical rows per 128-lane physical row ----
    pack = _LANES // d if (d < _LANES and _LANES % d == 0) else 1
    pack = max(math.gcd(pack, rows), 1)
    packed_rows = rows // pack
    width = pack * d

    x2 = x.reshape(packed_rows, width)
    # Weight pre-tiled across the `pack` segments and pre-cast in the wrapper.
    w2 = jnp.tile(weight.astype(out_dtype).reshape(1, d), (1, pack))        # (1, width)
    # Block-diagonal ones matrices: segment-sum (width, pack) and its transpose.
    seg_np = np.kron(np.eye(pack, dtype=np.float32), np.ones((d, 1), np.float32))
    seg = jnp.asarray(seg_np)                                               # (width, pack)
    segt = jnp.asarray(np.ascontiguousarray(seg_np.T))                      # (pack, width)

    # ---- byte-budgeted block sizing ----
    row_bytes = width * (np.dtype(x.dtype).itemsize + np.dtype(out_dtype).itemsize)
    if block_rows is None:
        block_rows = _pick_block_rows(packed_rows, row_bytes)
    grid = (packed_rows // block_rows,)

    kernel = functools.partial(rmsnorm_kernel, inv_d=1.0 / d, eps=float(eps))
    out = pl.pallas_call(
        kernel,
        out_shape=jax.ShapeDtypeStruct((packed_rows, width), out_dtype),
        grid_spec=pltpu.PrefetchScalarGridSpec(
            num_scalar_prefetch=0,
            grid=grid,
            in_specs=[
                pl.BlockSpec((block_rows, width), lambda i: (i, 0)),   # row tile of x
                pl.BlockSpec((1, width), lambda i: (0, 0)),            # weight (resident)
                pl.BlockSpec((width, pack), lambda i: (0, 0)),         # segment-sum ones
                pl.BlockSpec((pack, width), lambda i: (0, 0)),         # segment-broadcast ones
            ],
            out_specs=pl.BlockSpec((block_rows, width), lambda i: (i, 0)),
        ),
        compiler_params=pltpu.CompilerParams(
            # Rows are independent -> "parallel": v7x can shard grid steps across its
            # two TensorCores; single-TC v5e/v6e just run the (minimal) serial loop.
            dimension_semantics=("parallel",),
            vmem_limit_bytes=_VMEM_LIMIT_BYTES,
        ),
    )(x2, w2, seg, segt)
    return out.reshape(orig_shape)


# ---------------- pure-JAX reference (mirrors the PyTorch forward) ----------------
def reference_rmsnorm(x, weight, eps=EPS):
    xf = x.astype(jnp.float32)
    norm = xf * jax.lax.rsqrt(jnp.mean(xf * xf, axis=-1, keepdims=True) + eps)
    return norm.astype(x.dtype) * weight


if __name__ == "__main__":
    key = jax.random.PRNGKey(0)
    kx, kw = jax.random.split(key)
    x = jax.random.normal(kx, (B, S, D), dtype=jnp.float32)
    # torch init is ones; use a non-trivial weight so the scale path is exercised.
    weight = (1.0 + 0.1 * jax.random.normal(kw, (D,))).astype(jnp.float32)

    out = jax.block_until_ready(rmsnorm(x, weight))

    ref = reference_rmsnorm(x, weight)
    np.testing.assert_allclose(np.asarray(out), np.asarray(ref), rtol=1e-5, atol=1e-5)

    print("KERNEL_OK")
</pallas_src>

<mosaic_0001>
module attributes {stable_mosaic.version = 11 : i64} {
  func.func @rmsnorm_kernel(%arg0: i32, %arg1: memref<4x128xf32, #tpu.memory_space<vmem>>, %arg2: memref<1x128xf32, #tpu.memory_space<vmem>>, %arg3: memref<128x4xf32, #tpu.memory_space<vmem>>, %arg4: memref<4x128xf32, #tpu.memory_space<vmem>>, %arg5: memref<4x128xf32, #tpu.memory_space<vmem>>) attributes {dimension_semantics = [#tpu.dimension_semantics<parallel>], iteration_bounds = array<i64: 1>, scalar_prefetch = 0 : i64, scratch_operands = 0 : i64, tpu.core_type = #tpu.core_type<tc>, window_params = [{transform_indices = @transform_0, window_bounds = array<i64: 4, 128>}, {pipeline_mode = #tpu.pipeline_mode<synchronous>, transform_indices = @transform_1, window_bounds = array<i64: 1, 128>}, {pipeline_mode = #tpu.pipeline_mode<synchronous>, transform_indices = @transform_2, window_bounds = array<i64: 128, 4>}, {pipeline_mode = #tpu.pipeline_mode<synchronous>, transform_indices = @transform_3, window_bounds = array<i64: 4, 128>}, {transform_indices = @transform_4, window_bounds = array<i64: 4, 128>}]} {
    %c0 = arith.constant 0 : index
    %c0_0 = arith.constant 0 : index
    %0 = vector.load %arg1[%c0, %c0_0] : memref<4x128xf32, #tpu.memory_space<vmem>>, vector<4x128xf32>
    %1 = arith.mulf %0, %0 : vector<4x128xf32>
    %c0_1 = arith.constant 0 : index
    %c0_2 = arith.constant 0 : index
    %2 = vector.load %arg3[%c0_1, %c0_2] : memref<128x4xf32, #tpu.memory_space<vmem>>, vector<128x4xf32>
    %cst = arith.constant dense<0.000000e+00> : vector<4x4xf32>
    %3 = tpu.matmul %1, %2, %cst {dimension_numbers = #tpu.dot_dimension_numbers<[1], [0], [0], [1], [0, 0, 1, 1], [], []>, precision = #tpu.contract_precision<fp32>} : vector<4x128xf32>, vector<128x4xf32>, vector<4x4xf32> -> vector<4x4xf32>
    %cst_3 = arith.constant 3.125000e-02 : f32
    %4 = vector.broadcast %cst_3 : f32 to vector<4x4xf32>
    %5 = arith.mulf %3, %4 : vector<4x4xf32>
    %cst_4 = arith.constant 9.99999974E-6 : f32
    %6 = vector.broadcast %cst_4 : f32 to vector<4x4xf32>
    %7 = arith.addf %5, %6 : vector<4x4xf32>
    %8 = math.rsqrt %7 : vector<4x4xf32>
    %c0_5 = arith.constant 0 : index
    %c0_6 = arith.constant 0 : index
    %9 = vector.load %arg4[%c0_5, %c0_6] : memref<4x128xf32, #tpu.memory_space<vmem>>, vector<4x128xf32>
    %cst_7 = arith.constant dense<0.000000e+00> : vector<4x128xf32>
    %10 = tpu.matmul %8, %9, %cst_7 {dimension_numbers = #tpu.dot_dimension_numbers<[1], [0], [0], [1], [0, 0, 1, 1], [], []>, precision = #tpu.contract_precision<fp32>} : vector<4x4xf32>, vector<4x128xf32>, vector<4x128xf32> -> vector<4x128xf32>
    %11 = arith.mulf %0, %10 : vector<4x128xf32>
    %c0_8 = arith.constant 0 : index
    %c0_9 = arith.constant 0 : index
    %12 = vector.load %arg2[%c0_8, %c0_9] : memref<1x128xf32, #tpu.memory_space<vmem>>, vector<1x128xf32>
    %13 = vector.broadcast %12 : vector<1x128xf32> to vector<4x128xf32>
    %14 = arith.mulf %11, %13 : vector<4x128xf32>
    %c0_10 = arith.constant 0 : index
    %c0_11 = arith.constant 0 : index
    %15 = vector.load %arg5[%c0_10, %c0_11] : memref<4x128xf32, #tpu.memory_space<vmem>>, vector<4x128xf32>
    tpu.vector_store %arg5[%c0_10, %c0_11], %14 {strides = array<i32>} : memref<4x128xf32, #tpu.memory_space<vmem>>, vector<4x128xf32>,
    return
  }
  func.func @transform_0(%arg0: i32) -> (i32, i32) {
    %c0_i32 = arith.constant 0 : i32
    %c0_i32_0 = arith.constant 0 : i32
    return %arg0, %c0_i32 : i32, i32
  }
  func.func @transform_1(%arg0: i32) -> (i32, i32) {
    %c0_i32 = arith.constant 0 : i32
    %c0_i32_0 = arith.constant 0 : i32
    %c0_i32_1 = arith.constant 0 : i32
    return %c0_i32, %c0_i32_0 : i32, i32
  }
  func.func @transform_2(%arg0: i32) -> (i32, i32) {
    %c0_i32 = arith.constant 0 : i32
    %c0_i32_0 = arith.constant 0 : i32
    %c0_i32_1 = arith.constant 0 : i32
    return %c0_i32, %c0_i32_0 : i32, i32
  }
  func.func @transform_3(%arg0: i32) -> (i32, i32) {
    %c0_i32 = arith.constant 0 : i32
    %c0_i32_0 = arith.constant 0 : i32
    %c0_i32_1 = arith.constant 0 : i32
    return %c0_i32, %c0_i32_0 : i32, i32
  }
  func.func @transform_4(%arg0: i32) -> (i32, i32) {
    %c0_i32 = arith.constant 0 : i32
    %c0_i32_0 = arith.constant 0 : i32
    return %arg0, %c0_i32 : i32, i32
  }
}

</mosaic_0001>

<bundles_post_ra>
// kernel: tpu_custom_call.1
= control target key start
LH: loop header
LB: loop body
LE: loop exit
PB: predicated region body
PF: predicated region fallthrough
CT: control target
= control target key end

     0   :  { %v1706_v3 = vmov 0.0|0.0   ;;  %vm1707_vm0 = vmmov 0   ;;  %v1708_v11 = vmov 0.0   ;;  %s2090_s0 = inlined_call_operand.vmem [shape: f32[4,128], index: 0, kind: input, shape index: {}]   ;;  %s2091_s1 = inlined_call_operand.vmem [shape: f32[1,128], index: 1, kind: input, shape index: {}]   ;;  %s2092_s2 = inlined_call_operand.vmem [shape: f32[128,4], index: 2, kind: input, shape index: {}]   ;;  %s2093_s3 = inlined_call_operand.vmem [shape: f32[4,128], index: 3, kind: input, shape index: {}]   ;;  %s2094_s4 = inlined_call_operand.hbm [shape: f32[4,128], index: 4, kind: output, shape index: {}]  }
   0x1   :  { %v20_v0 = vld [vmem:[%s2092_s2] sm:$0xff]  ;;  %v21_v1 = vld [vmem:[%s2092_s2 + $0x8] sm:$0xff]  ;;  %v22_v2 = vld [vmem:[%s2092_s2 + $0x10] sm:$0xff]  ;;  %1514 = vmatprep.subr.bf16.mxu1 %v1706_v3  ;;  %1586 = vmatprep.subr.bf16.mxu0 %v1706_v3 }
   0x2   :  { %v37_v4 = vand.u32 4294901760, %v20_v0  ;;  %v40_v5 = vand.u32 4294901760, %v21_v1  ;;  %v23_v6 = vld [vmem:[%s2092_s2 + $0x18] sm:$0xff]  ;;  %v43_v7 = vand.u32 4294901760, %v22_v2  ;;  %v1752_v9 = vld [vmem:[%s2092_s2 + $0x20] sm:$0xff]  ;;  %v1757_v10 = vld [vmem:[%s2092_s2 + $0x28] sm:$0xff]  ;;  %1306 = vmatprep.mubr.msk.f32.mxu1 %vm1707_vm0, %v1708_v11  ;;  %1411 = vmatprep.mubr.msk.f32.mxu0 %vm1707_vm0, %v1708_v11 }
   0x3   :  { %v46_v8 = vand.u32 4294901760, %v23_v6  ;;  %v49_v14 = vand.u32 4294901760, %v1752_v9  ;;  %v52_v15 = vand.u32 4294901760, %v1757_v10  ;;  %v1776_v16 = vld [vmem:[%s2092_s2 + $0x30] sm:$0xff]  ;;  %v1781_v17 = vld [vmem:[%s2092_s2 + $0x38] sm:$0xff] }
   0x4   :  { %v1763_v12 = vpack.c.bf16 %v40_v5, %v37_v4 }
   0x5   :  { %v1767_v13 = vpack.c.bf16 %v46_v8, %v43_v7 }
   0x6   :  { %1516 = vmatpush3.bf16.msra.mxu1 %v1763_v12  ;;  %1588 = vmatpush3.bf16.msra.mxu0 %v1763_v12 }
   0x7   :  { %1517 = vmatprep.subr.bf16.mxu1 %v1706_v3  ;;  %1589 = vmatprep.subr.bf16.mxu0 %v1706_v3 }
   0x8   :  { %9 = vsyncpa [#allocation3], 0  ;;  %v1785_v18 = vpack.c.bf16 %v52_v15, %v49_v14  ;;  %v55_v19 = vand.u32 4294901760, %v1776_v16  ;;  %v58_v20 = vand.u32 4294901760, %v1781_v17  ;;  %v1792_v21 = vld [vmem:[%s2090_s0] sm:$0xf]  ;;  %v1826_v30 = vsub.f32 %v20_v0, %v37_v4 }
   0x9   :  { %v1799_v22 = vld [vmem:[%s2092_s2 + $0x40] sm:$0xff]  ;;  %v1804_v23 = vld [vmem:[%s2092_s2 + $0x48] sm:$0xff]  ;;  %v19_v24 = vmul.f32 %v1792_v21, %v1792_v21  ;;  %v1819_v28 = vld [vmem:[%s2092_s2 + $0x50] sm:$0xff]  ;;  %v1830_v32 = vsub.f32 %v21_v1, %v40_v5  ;;  %v1850_v38 = vsub.f32 %v22_v2, %v43_v7  ;;  %v1852_v39 = vsub.f32 %v23_v6, %v46_v8  ;;  %s1709_s24 = smov [#allocation2]  }
   0xa   :  { %1519 = vmatpush3.bf16.msra.mxu1 %v1767_v13  ;;  %1591 = vmatpush3.bf16.msra.mxu0 %v1767_v13  ;;  %v1810_v25 = vpack.c.bf16 %v58_v20, %v55_v19  ;;  %v61_v26 = vand.u32 4294901760, %v1799_v22  ;;  %v64_v27 = vand.u32 4294901760, %v1804_v23  ;;  %v1824_v29 = vld [vmem:[%s2092_s2 + $0x58] sm:$0xff]  ;;  %v67_v34 = vand.u32 4294901760, %v1819_v28  ;;  %v1841_v36 = vld [vmem:[%s2092_s2 + $0x60] sm:$0xff]  ;;  %v1848_v37 = vld [vmem:[%s2092_s2 + $0x68] sm:$0xff] }
   0xb   :  { %1520 = vmatprep.subr.bf16.mxu1 %v1706_v3  ;;  %1592 = vmatprep.subr.bf16.mxu0 %v1706_v3  ;;  %v1828_v31 = vand.u32 4294901760, %v19_v24  ;;  %v70_v35 = vand.u32 4294901760, %v1824_v29  ;;  %v73_v40 = vand.u32 4294901760, %v1841_v36  ;;  %v76_v43 = vand.u32 4294901760, %v1848_v37  ;;  %v1870_v44 = vld [vmem:[%s2092_s2 + $0x70] sm:$0xff]  ;;  %v1875_v45 = vld [vmem:[%s2092_s2 + $0x78] sm:$0xff] }
   0xc   :  { %v1834_v33 = vpack.c.bf16 %v64_v27, %v61_v26  ;;  %v130_v46 = vand.u32 4294901760, %v1826_v30  ;;  %v137_v47 = vand.u32 4294901760, %v1830_v32  ;;  %v1882_v48 = vsub.f32 %v1752_v9, %v49_v14  ;;  %s1151_s25 = sshll.u32 %s1709_s24, 4  ;;  %s1152_s25 = int_to_ptr.vmem [resolvable:$true] %s1151_s25 }
   0xd   :  { %v1856_v41 = vsub.f32 %v19_v24, %v1828_v31  ;;  %v1864_v42 = vpack.c.bf16 %v70_v35, %v67_v34  ;;  %v1885_v49 = vsub.f32 %v1757_v10, %v52_v15  ;;  %v79_v50 = vand.u32 4294901760, %v1870_v44  ;;  %s1682_s26 = scalar_lea.vmem %s1152_s25, 64  ;;  %p1687_p1 = scmp.lt.s32.totalorder %s1152_s25, %s1152_s25 }
   0xe   :  { %1522 = vmatpush3.bf16.msra.mxu1 %v1785_v18  ;;  %1594 = vmatpush3.bf16.msra.mxu0 %v1785_v18  ;;  %v82_v51 = vand.u32 4294901760, %v1875_v45  ;;  %v144_v53 = vand.u32 4294901760, %v1850_v38  ;;  %v1897_v54 = vpack.c.bf16 %v76_v43, %v73_v40  ;;  %v131_v55 = vsub.f32 %v1826_v30, %v130_v46  ;;  %p1683_p0 = scmp.ne.s32.totalorder %s1152_s25, %s1682_s26  ;;  %p1688_p2 = scmp.lt.s32.totalorder %s1682_s26, %s1682_s26 }
   0xf   :  { %1523 = vmatprep.subr.bf16.mxu1 %v1706_v3  ;;  %1595 = vmatprep.subr.bf16.mxu0 %v1706_v3  ;;  %v119_v52 = vand.u32 4294901760, %v1856_v41  ;;  %v138_v56 = vsub.f32 %v1830_v32, %v137_v47  ;;  %v151_v57 = vand.u32 4294901760, %v1852_v39  ;;  %v1905_v58 = vsub.f32 %v1776_v16, %v55_v19 }
  0x10   :  { %v1908_v59 = vsub.f32 %v1781_v17, %v58_v20  ;;  %v145_v61 = vsub.f32 %v1850_v38, %v144_v53  ;;  %v158_v62 = vand.u32 4294901760, %v1882_v48  ;;  %v165_v63 = vand.u32 4294901760, %v1885_v49  ;;  %p1689_p3 = por %p1688_p2, %p1687_p1 }
  0x11   :  { %v120_v60 = vsub.f32 %v1856_v41, %v119_v52  ;;  %v1920_v0 = vpack.c.bf16 %v82_v51, %v79_v50  ;;  %v132_v1 = vand.u32 4294901760, %v131_v55  ;;  %v139_v2 = vand.u32 4294901760, %v138_v56 }
  0x12   :  { %1525 = vmatpush3.bf16.msra.mxu1 %v1810_v25  ;;  %1597 = vmatpush3.bf16.msra.mxu0 %v1810_v25  ;;  %v152_v4 = vsub.f32 %v1852_v39, %v151_v57  ;;  %v1926_v5 = vsub.f32 %v1799_v22, %v61_v26  ;;  %v1929_v6 = vsub.f32 %v1804_v23, %v64_v27  ;;  %v146_v9 = vand.u32 4294901760, %v145_v61  ;;  %p1690_p4 = pnand %p1689_p3, %p1683_p0 }
  0x13   :  { %1526 = vmatprep.subr.bf16.mxu1 %v1706_v3  ;;  %1598 = vmatprep.subr.bf16.mxu0 %v1706_v3  ;;  %v1611_v7 = vpack.c.bf16 %v137_v47, %v130_v46  ;;  %v121_v8 = vand.u32 4294901760, %v120_v60  ;;  %v159_v10 = vsub.f32 %v1882_v48, %v158_v62  ;;  %v166_v14 = vsub.f32 %v1885_v49, %v165_v63 }
  0x14   :  { %v1539_v15 = vpack.c.bf16 %v139_v2, %v132_v1  ;;  %v153_v16 = vand.u32 4294901760, %v152_v4  ;;  %v172_v17 = vand.u32 4294901760, %v1905_v58  ;;  %v179_v19 = vand.u32 4294901760, %v1908_v59 }
  0x15   :  { %v1942_v20 = vsub.f32 %v1819_v28, %v67_v34  ;;  %v1947_v22 = vsub.f32 %v1824_v29, %v70_v35  ;;  %v1614_v23 = vpack.c.bf16 %v151_v57, %v144_v53  ;;  %v160_v24 = vand.u32 4294901760, %v159_v10 }
  0x16   :  { %1528 = vmatpush3.bf16.msra.mxu1 %v1834_v33  ;;  %1600 = vmatpush3.bf16.msra.mxu0 %v1834_v33  ;;  %v167_v26 = vand.u32 4294901760, %v166_v14  ;;  %v186_v27 = vand.u32 4294901760, %v1926_v5  ;;  %v1542_v46 = vpack.c.bf16 %v153_v16, %v146_v9  ;;  %v173_v47 = vsub.f32 %v1905_v58, %v172_v17 }
  0x17   :  { %1529 = vmatprep.subr.bf16.mxu1 %v1706_v3  ;;  %1601 = vmatprep.subr.bf16.mxu0 %v1706_v3  ;;  %v180_v28 = vsub.f32 %v1908_v59, %v179_v19  ;;  %v193_v34 = vand.u32 4294901760, %v1929_v6  ;;  %v1958_v29 = vsub.f32 %v1841_v36, %v73_v40  ;;  %v1963_v35 = vsub.f32 %v1848_v37, %v76_v43 }
  0x18   :  { %v1617_v53 = vpack.c.bf16 %v165_v63, %v158_v62  ;;  %v187_v55 = vsub.f32 %v1926_v5, %v186_v27  ;;  %v200_v56 = vand.u32 4294901760, %v1942_v20  ;;  %v174_v36 = vand.u32 4294901760, %v173_v47 }
  0x19   :  { %v181_v40 = vand.u32 4294901760, %v180_v28  ;;  %v194_v57 = vsub.f32 %v1929_v6, %v193_v34  ;;  %v207_v37 = vand.u32 4294901760, %v1947_v22  ;;  %v1978_v43 = vsub.f32 %v1870_v44, %v79_v50 }
  0x1a   :  { %1531 = vmatpush3.bf16.msra.mxu1 %v1864_v42  ;;  %1603 = vmatpush3.bf16.msra.mxu0 %v1864_v42  ;;  %v1983_v60 = vsub.f32 %v1875_v45, %v82_v51  ;;  %v1620_v61 = vpack.c.bf16 %v179_v19, %v172_v17  ;;  %v188_v62 = vand.u32 4294901760, %v187_v55  ;;  %v201_v63 = vsub.f32 %v1942_v20, %v200_v56 }
  0x1b   :  { %1532 = vmatprep.subr.bf16.mxu1 %v1706_v3  ;;  %1604 = vmatprep.subr.bf16.mxu0 %v1706_v3  ;;  %v214_v1 = vand.u32 4294901760, %v1958_v29  ;;  %v1548_v2 = vpack.c.bf16 %v181_v40, %v174_v36  ;;  %v195_v4 = vand.u32 4294901760, %v194_v57  ;;  %v221_v44 = vand.u32 4294901760, %v1963_v35 }
  0x1c   :  { %v1623_v45 = vpack.c.bf16 %v193_v34, %v186_v27  ;;  %v202_v50 = vand.u32 4294901760, %v201_v63  ;;  %v1626_v16 = vpack.c.bf16 %v207_v37, %v200_v56  ;;  %v1566_v55 = vpack.c.bf16 %v1852_v39, %v1850_v38 }
  0x1d   :  { %v215_v51 = vsub.f32 %v1958_v29, %v214_v1  ;;  %v1551_v9 = vpack.c.bf16 %v195_v4, %v188_v62  ;;  %v222_v14 = vsub.f32 %v1963_v35, %v221_v44  ;;  %vm685_vm1 = vcmask 1043456  }
  0x1e   :  { %1534 = vmatpush3.bf16.msra.mxu1 %v1897_v54  ;;  %1606 = vmatpush3.bf16.msra.mxu0 %v1897_v54  ;;  %vm681_vm2 = vcmask 31744  }
  0x1f   :  { %1535 = vmatprep.subr.bf16.mxu1 %v1706_v3  ;;  %1607 = vmatprep.subr.bf16.mxu0 %v1706_v3  ;;  %v216_v17 = vand.u32 4294901760, %v215_v51 }
  0x22   :  { %1537 = vmatpush3.bf16.msra.mxu1 %v1920_v0  ;;  %1609 = vmatpush3.bf16.msra.mxu0 %v1920_v0 }
  0x23   :  { %1538 = vmatprep.subr.bf16.mxu1 %v1706_v3  ;;  %1610 = vmatprep.subr.bf16.mxu0 %v1706_v3 }
  0x25   :  { %1307 = vmatmul.mubr.f32.vlgmr.msra.gmra.mrb[0].mxu1 %v121_v8  ;;  %1412 = vmatmul.mubr.f32.vlgmr.msra.gmra.mrb[0].mxu0 %v119_v52  ;;  %v1545_v52 = vpack.c.bf16 %v167_v26, %v160_v24  ;;  %v228_v8 = vand.u32 4294901760, %v1978_v43 }
  0x26   :  { %1540 = vmatpush3.bf16.msra.mxu1 %v1539_v15  ;;  %1612 = vmatpush3.bf16.msra.mxu0 %v1611_v7  ;;  %v208_v7 = vsub.f32 %v1947_v22, %v207_v37  ;;  %v235_v15 = vand.u32 4294901760, %v1983_v60 }
  0x27   :  { %1541 = vmatprep.subr.bf16.mxu1 %v1706_v3  ;;  %1613 = vmatprep.subr.bf16.mxu0 %v1706_v3  ;;  %v229_v24 = vsub.f32 %v1978_v43, %v228_v8 }
  0x28   :  { %1341 = vmatprep.mubr.msk.f32.mxu1 %vm1707_vm0, %v1708_v11  ;;  %1446 = vmatprep.mubr.msk.f32.mxu0 %vm1707_vm0, %v1708_v11  ;;  %v209_v10 = vand.u32 4294901760, %v208_v7  ;;  %v236_v26 = vsub.f32 %v1983_v60, %v235_v15 }
  0x29   :  { %v230_v47 = vand.u32 4294901760, %v229_v24 }
  0x2a   :  { %1543 = vmatpush3.bf16.msra.mxu1 %v1542_v46  ;;  %1615 = vmatpush3.bf16.msra.mxu0 %v1614_v23  ;;  %v1554_v19 = vpack.c.bf16 %v209_v10, %v202_v50  ;;  %v223_v23 = vand.u32 4294901760, %v222_v14  ;;  %v1629_v46 = vpack.c.bf16 %v221_v44, %v214_v1  ;;  %v237_v28 = vand.u32 4294901760, %v236_v26 }
  0x2b   :  { %1544 = vmatprep.subr.bf16.mxu1 %v1706_v3  ;;  %1616 = vmatprep.subr.bf16.mxu0 %v1706_v3 }
  0x2c   :  { %v1557_v27 = vpack.c.bf16 %v223_v23, %v216_v17  ;;  %v1560_v34 = vpack.c.bf16 %v237_v28, %v230_v47 }
  0x2e   :  { %1546 = vmatpush3.bf16.msra.mxu1 %v1545_v52  ;;  %1618 = vmatpush3.bf16.msra.mxu0 %v1617_v53  ;;  %v1632_v52 = vpack.c.bf16 %v235_v15, %v228_v8  ;;  %v1563_v53 = vpack.c.bf16 %v1830_v32, %v1826_v30  ;;  %v1569_v30 = vpack.c.bf16 %v1885_v49, %v1882_v48 }
  0x2f   :  { %1547 = vmatprep.subr.bf16.mxu1 %v1706_v3  ;;  %1619 = vmatprep.subr.bf16.mxu0 %v1706_v3  ;;  %v1584_v32 = vpack.c.bf16 %v1983_v60, %v1978_v43 }
  0x32   :  { %1549 = vmatpush3.bf16.msra.mxu1 %v1548_v2  ;;  %1621 = vmatpush3.bf16.msra.mxu0 %v1620_v61  ;;  %v1159_v61 = vld [vmem:[%s2091_s1] ss:$0 sm:$0xff] }
  0x33   :  { %1550 = vmatprep.subr.bf16.mxu1 %v1706_v3  ;;  %1622 = vmatprep.subr.bf16.mxu0 %v1706_v3 }
  0x36   :  { %1552 = vmatpush3.bf16.msra.mxu1 %v1551_v9  ;;  %1624 = vmatpush3.bf16.msra.mxu0 %v1623_v45 }
  0x37   :  { %1553 = vmatprep.subr.bf16.mxu1 %v1706_v3  ;;  %1625 = vmatprep.subr.bf16.mxu0 %v1706_v3 }
  0x3a   :  { %1555 = vmatpush3.bf16.msra.mxu1 %v1554_v19  ;;  %1627 = vmatpush3.bf16.msra.mxu0 %v1626_v16 }
  0x3b   :  { %1556 = vmatprep.subr.bf16.mxu1 %v1706_v3  ;;  %1628 = vmatprep.subr.bf16.mxu0 %v1706_v3 }
  0x3e   :  { %1558 = vmatpush3.bf16.msra.mxu1 %v1557_v27  ;;  %1630 = vmatpush3.bf16.msra.mxu0 %v1629_v46 }
  0x3f   :  { %1559 = vmatprep.subr.bf16.mxu1 %v1706_v3  ;;  %1631 = vmatprep.subr.bf16.mxu0 %v1706_v3 }
  0x42   :  { %1561 = vmatpush3.bf16.msra.mxu1 %v1560_v34  ;;  %1633 = vmatpush3.bf16.msra.mxu0 %v1632_v52 }
  0x43   :  { %1562 = vmatprep.subr.bf16.mxu1 %v1706_v3  ;;  %1634 = vmatprep.subr.bf16.mxu0 %v1706_v3 }
  0x45   :  { %1342 = vmatmul.mubr.f32.vlgmr.msra.gmra.mrb[0].mxu1 %v1828_v31  ;;  %1447 = vmatmul.mubr.f32.vlgmr.msra.gmra.mrb[0].mxu0 %v1828_v31 }
  0x46   :  { %1564 = vmatpush3.bf16.msra.mxu1 %v1563_v53  ;;  %1636 = vmatpush3.bf16.msra.mxu0 %v1763_v12  ;;  %v1572_v12 = vpack.c.bf16 %v1908_v59, %v1905_v58 }
  0x47   :  { %1565 = vmatprep.subr.bf16.mxu1 %v1706_v3  ;;  %1637 = vmatprep.subr.bf16.mxu0 %v1706_v3 }
  0x48   :  { %1376 = vmatprep.mubr.msk.f32.mxu1 %vm1707_vm0, %v1708_v11  ;;  %1481 = vmatprep.mubr.msk.f32.mxu0 %vm1707_vm0, %v1708_v11 }
  0x4a   :  { %1567 = vmatpush3.bf16.msra.mxu1 %v1566_v55  ;;  %1639 = vmatpush3.bf16.msra.mxu0 %v1767_v13  ;;  %v1575_v13 = vpack.c.bf16 %v1929_v6, %v1926_v5 }
  0x4b   :  { %1568 = vmatprep.subr.bf16.mxu1 %v1706_v3  ;;  %1640 = vmatprep.subr.bf16.mxu0 %v1706_v3 }
  0x4e   :  { %1570 = vmatpush3.bf16.msra.mxu1 %v1569_v30  ;;  %1642 = vmatpush3.bf16.msra.mxu0 %v1785_v18  ;;  %v1578_v18 = vpack.c.bf16 %v1947_v22, %v1942_v20 }
  0x4f   :  { %1571 = vmatprep.subr.bf16.mxu1 %v1706_v3  ;;  %1643 = vmatprep.subr.bf16.mxu0 %v1706_v3 }
  0x52   :  { %1573 = vmatpush3.bf16.msra.mxu1 %v1572_v12  ;;  %1645 = vmatpush3.bf16.msra.mxu0 %v1810_v25  ;;  %v1581_v25 = vpack.c.bf16 %v1963_v35, %v1958_v29 }
  0x53   :  { %1574 = vmatprep.subr.bf16.mxu1 %v1706_v3  ;;  %1646 = vmatprep.subr.bf16.mxu0 %v1706_v3 }
  0x56   :  { %1576 = vmatpush3.bf16.msra.mxu1 %v1575_v13  ;;  %1648 = vmatpush3.bf16.msra.mxu0 %v1834_v33 }
  0x57   :  { %1577 = vmatprep.subr.bf16.mxu1 %v1706_v3  ;;  %1649 = vmatprep.subr.bf16.mxu0 %v1706_v3 }
  0x5a   :  { %1579 = vmatpush3.bf16.msra.mxu1 %v1578_v18  ;;  %1651 = vmatpush3.bf16.msra.mxu0 %v1864_v42 }
  0x5b   :  { %1580 = vmatprep.subr.bf16.mxu1 %v1706_v3  ;;  %1652 = vmatprep.subr.bf16.mxu0 %v1706_v3 }
  0x5e   :  { %1582 = vmatpush3.bf16.msra.mxu1 %v1581_v25  ;;  %1654 = vmatpush3.bf16.msra.mxu0 %v1897_v54 }
  0x5f   :  { %1583 = vmatprep.subr.bf16.mxu1 %v1706_v3  ;;  %1655 = vmatprep.subr.bf16.mxu0 %v1706_v3  ;;  %v680_v3 = vld [vmem:[%s2093_s3] sm:$0xf] }
  0x60   :  { %v687_v33 = vsel %vm685_vm1, %v680_v3, 0 }
  0x61   :  { %v690_v38 = vand.u32 4294901760, %v687_v33 }
  0x62   :  { %1585 = vmatpush3.bf16.msra.mxu1 %v1584_v32  ;;  %1657 = vmatpush3.bf16.msra.mxu0 %v1920_v0 }
  0x63   :  { %1499 = vmatprep.subr.mxu1 %v1708_v11  ;;  %1484 = vmatprep.subr.mxu0 %v1708_v11  ;;  %v767_v58 = vsub.f32 %v687_v33, %v690_v38 }
  0x65   :  { %1377 = vmatmul.mubr.f32.vlgmr.msra.gmra.mrb[0].mxu1 %v1856_v41  ;;  %1482 = vmatmul.mubr.f32.vlgmr.msra.gmra.mrb[0].mxu0 %v1828_v31  ;;  %v768_v5 = vand.u32 4294901760, %v767_v58 }
  0x66   :  { %1501 = vmatprep.mubr.msk.f32.mxu1 %vm1707_vm0, %v1708_v11  ;;  %1486 = vmatprep.mubr.msk.f32.mxu0 %vm1707_vm0, %v1708_v11 }
  0x67   :  { %1500 = vmatpush3.msra.mxu1 %v690_v38  ;;  %1485 = vmatpush3.msra.mxu0 %v690_v38  ;;  %v769_v22 = vsub.f32 %v767_v58, %v768_v5 }
  0x68   :  { %1489 = vmatprep.subr.mxu0 %v1708_v11  ;;  %1504 = vmatprep.subr.mxu1 %v1708_v11 }
  0x69   :  { %v770_v56 = vand.u32 4294901760, %v769_v22 }
 0x138   :  { %v378_v31 = vpop.f32.mrb[0].mxu1  ;;  %v673_v39 = vpop.f32.mrb[0].mxu0 }
 0x139   :  { %v1658_v41 = vadd.f32 %v673_v39, %v378_v31  ;;  %v1378_v42 = vpop.f32.mrb[1].mxu1  ;;  %v1483_v48 = vpop.f32.mrb[1].mxu0 }
 0x13b   :  { %v677_v49 = vmul.f32 0.03125, %v1658_v41 }
 0x13d   :  { %v678_v54 = vadd.f32 1e-05, %v677_v49 }
 0x13f   :  { %1680 = vrsqrt.f32 %v678_v54 }
 0x149   :  { %v1681_v59 = vpop.eup %1680 }
 0x14a   :  { %v683_v0 = vsel %vm681_vm2, %v1681_v59, 0 }
 0x14b   :  { %v755_v6 = vand.u32 4294901760, %v683_v0 }
 0x14d   :  { %v756_v20 = vsub.f32 %v683_v0, %v755_v6 }
 0x14f   :  { %v757_v29 = vand.u32 4294901760, %v756_v20 }
 0x151   :  { %1502 = vmatmul.mubr.f32.vlgmr.msra.gmra.mrb[2].mxu1 %v757_v29  ;;  %v758_v35 = vsub.f32 %v756_v20, %v757_v29 }
 0x152   :  { %1505 = vmatpush3.msra.mxu1 %v768_v5  ;;  %1506 = vmatprep.mubr.msk.f32.mxu1 %vm1707_vm0, %v1708_v11 }
 0x153   :  { %v759_v36 = vand.u32 4294901760, %v758_v35  ;;  %1509 = vmatprep.subr.mxu1 %v1708_v11 }
 0x155   :  { %1487 = vmatmul.mubr.f32.vlgmr.msra.gmra.mrb[2].mxu0 %v759_v36 }
 0x156   :  { %1490 = vmatpush3.msra.mxu0 %v770_v56  ;;  %1491 = vmatprep.mubr.msk.f32.mxu0 %vm1707_vm0, %v1708_v11 }
 0x157   :  { %1494 = vmatprep.subr.mxu0 %v1708_v11 }
 0x159   :  { %1507 = vmatmul.mubr.f32.vlgmr.msra.gmra.mrb[2].mxu1 %v755_v6 }
 0x15a   :  { %1510 = vmatpush3.msra.mxu1 %v690_v38  ;;  %1511 = vmatprep.mubr.msk.f32.mxu1 %vm1707_vm0, %v1708_v11 }
 0x15d   :  { %1492 = vmatmul.mubr.f32.vlgmr.msra.gmra.mrb[2].mxu0 %v755_v6 }
 0x15e   :  { %1495 = vmatpush3.msra.mxu0 %v767_v58  ;;  %1496 = vmatprep.mubr.msk.f32.mxu0 %vm1707_vm0, %v1708_v11 }
 0x161   :  { %1512 = vmatmul.mubr.f32.vlgmr.msra.gmra.mrb[2].mxu1 %v755_v6 }
 0x165   :  { %1497 = vmatmul.mubr.f32.vlgmr.msra.gmra.mrb[2].mxu0 %v756_v20 }
 0x234   :  { %v1131_v40 = vpop.f32.mrb[2].mxu1 }
 0x235   :  { %v1513_v57 = vpop.f32.mrb[3].mxu1 }
 0x238   :  { %v911_v37 = vpop.f32.mrb[2].mxu0 }
 0x239   :  { %v1659_v43 = vadd.f32 %v1131_v40, %v911_v37  ;;  %v1498_v60 = vpop.f32.mrb[3].mxu0 }
 0x23b   :  { %v1135_v62 = vmul.f32 %v1659_v43, %v1792_v21 }
 0x23d   :  { %v1143_v63 = vmul.f32 %v1159_v61, %v1135_v62 }
 0x23f   :  { %1144 = vst [vmem:[#allocation2] sm:$0xf] %v1143_v63 }
 0x240   :  { %1693 = shalt.err (!%p1690_p4)
}
 0x241   :  { %s1694_s29 = scalar_lea.hbm %s2094_s4, 64 }
 0x242   :  { %p1695_p5 = scmp.ne.s32.totalorder %s2094_s4, %s1694_s29  ;;  %p1698_p6 = scmp.lt.u32.totalorder %s1694_s29, %s2094_s4 }
 0x244   :  { %p1700_p7 = pnand %p1698_p6, %p1695_p5 }
 0x246   :  { %1703 = shalt.err (!%p1700_p7)
}
 0x247   :  { %1154 = dma.vmem_to_hbm [thread:$0]  %s1152_s25, 64, %s2094_s4, [#allocation3]  }
 0x248   :  { %1704 = dma.done.wait [#allocation3], 64  }
 0x249   :  { %1705 = vsyncadd [#allocation3], 4294967232 }
 0x24a   :  { %1158 = vsyncpa [#allocation3], 1 }

</bundles_post_ra>
